<compile_context>
chip_gen: v6e
topology: v6e:2x2x1
jax: 0.10.0
libtpu: 0.0.40
codegen_flags: <defaults>
</compile_context>

<pallas_src>
import functools
import math

import jax
import jax.numpy as jnp
from jax.experimental import pallas as pl
from jax.experimental.pallas import tpu as pltpu


def _ln_rowwise_kernel(alpha_ref, bias_ref, x_ref, o_ref, *, eps: float):
    """hidden lives whole in the lane axis; one row = one normalization group."""
    n = jnp.float32(x_ref.shape[-1])
    mean = jnp.sum(x_ref[...].astype(jnp.float32), axis=-1, keepdims=True) / n
    xc = x_ref[...].astype(jnp.float32) - mean                    # two-pass (centered)
    var = jnp.sum(xc * xc, axis=-1, keepdims=True) / (n - 1.0)    # unbiased (ddof=1)
    denom = jnp.sqrt(var) + eps                                   # std + eps
    inv = pl.reciprocal(denom, approx=True)                       # EUP
    inv = inv * (2.0 - denom * inv)                               # 1 Newton step ~ f32
    scale = alpha_ref[0] * inv
    o_ref[...] = ((x_ref[...].astype(jnp.float32) - mean) * scale
                  + bias_ref[0]).astype(o_ref.dtype)


def _ln_packed_kernel(alpha_ref, bias_ref, avg_ref, x_ref, o_ref, *,
                      eps: float, hidden: int):
    """pack = 128 // hidden rows folded into one lane-dense 128-wide row.

    avg_ref is a constant block-diagonal (128,128) matrix with 1/hidden inside
    each group's block, so `x @ avg` gives every lane its own group's mean
    in place (segmented reduction + broadcast as a single MXU matmul; no
    cross-lane VPU/XLU work, stores stay unmasked).
    """
    n = jnp.float32(hidden)
    a = avg_ref[...]                                               # (128, 128) f32
    mean_l = jnp.dot(x_ref[...].astype(jnp.float32), a,
                     preferred_element_type=jnp.float32)           # per-lane group mean
    xc = x_ref[...].astype(jnp.float32) - mean_l
    var_l = jnp.dot(xc * xc, a, preferred_element_type=jnp.float32) * (n / (n - 1.0))
    denom = jnp.sqrt(var_l) + eps
    inv = pl.reciprocal(denom, approx=True)
    inv = inv * (2.0 - denom * inv)
    o_ref[...] = (xc * (alpha_ref[0] * inv) + bias_ref[0]).astype(o_ref.dtype)


def _vmem_limit_bytes() -> int:
    """Generation-aware scoped-VMEM request: leave ~16 MiB headroom, cap at 100 MiB.

    v7x (64 MiB physical per TC) -> 48 MiB; v5e/v6e (128 MiB) -> 100 MiB.
    """
    try:
        physical = int(pltpu.get_tpu_info().vmem_capacity_bytes)
    except Exception:
        physical = 64 * 1024 * 1024  # conservative (v7x-sized) fallback
    return int(min(max(physical - (16 << 20), 32 << 20), 100 << 20))


def _pick_tile_rows(rows: int, width: int, in_itemsize: int, out_itemsize: int,
                    vmem_limit: int) -> int:
    """Byte-based block sizing: aim for ~8 MiB input blocks, capped by the exact
    pipeline footprint (2 input + 2 output buffers + ~3 f32 row temporaries)."""
    per_row = (2 * in_itemsize + 2 * out_itemsize + 3 * 4) * width
    budget = (vmem_limit * 2) // 3          # ~1/3 headroom for compiler scratch
    t_cap = max(budget // per_row, 8)
    t_target = max((8 << 20) // (width * in_itemsize), 8)
    t = int(min(t_cap, t_target))
    if t >= rows:
        return rows                          # single full-extent block
    return max(8, (t // 8) * 8)              # sublane-aligned; ragged last block OK


def layer_normalization(x, alpha, bias, eps: float = 1e-6, tile_rows=None):
    """Pallas TPU implementation of the reference LayerNormalization.forward."""
    orig_shape = x.shape
    hidden = int(orig_shape[-1])
    rows = int(math.prod(orig_shape[:-1])) if len(orig_shape) > 1 else 1
    x2d = x.reshape(rows, hidden)

    alpha1d = jnp.asarray(alpha, dtype=jnp.float32).reshape(1)
    bias1d = jnp.asarray(bias, dtype=jnp.float32).reshape(1)
    vmem_limit = _vmem_limit_bytes()
    itemsize = jnp.dtype(x.dtype).itemsize

    compiler_params = pltpu.CompilerParams(
        dimension_semantics=("parallel",),   # lets v7x shard rows across 2 TCs
        vmem_limit_bytes=vmem_limit,
    )

    pack = 128 // hidden if (1 < hidden < 128 and 128 % hidden == 0) else 1

    if pack > 1:
        # ---- Lane-dense packed path (hidden < 128): fold rows into lanes ----
        width = pack * hidden                                  # == 128
        rows_pad = ((rows + pack - 1) // pack) * pack
        if rows_pad != rows:
            x2d = jnp.pad(x2d, ((0, rows_pad - rows), (0, 0)))
        prows = rows_pad // pack
        xp = x2d.reshape(prows, width)                         # free view (contiguous)
        tile = tile_rows if tile_rows is not None else _pick_tile_rows(
            prows, width, itemsize, itemsize, vmem_limit)

        # Constant block-diagonal averaging matrix (built once on host/XLA side).
        lane = jnp.arange(width, dtype=jnp.int32)
        same = (lane[:, None] // hidden) == (lane[None, :] // hidden)
        avg = jnp.where(same, 1.0 / hidden, 0.0).astype(jnp.float32)

        out = pl.pallas_call(
            functools.partial(_ln_packed_kernel, eps=float(eps), hidden=hidden),
            out_shape=jax.ShapeDtypeStruct((prows, width), x.dtype),
            grid_spec=pltpu.PrefetchScalarGridSpec(
                num_scalar_prefetch=0,
                grid=(pl.cdiv(prows, tile),),
                in_specs=[
                    pl.BlockSpec(memory_space=pltpu.MemorySpace.SMEM),   # alpha (1,)
                    pl.BlockSpec(memory_space=pltpu.MemorySpace.SMEM),   # bias  (1,)
                    pl.BlockSpec((width, width), lambda i: (0, 0)),      # avg (resident)
                    pl.BlockSpec((tile, width), lambda i: (i, 0)),       # x
                ],
                out_specs=pl.BlockSpec((tile, width), lambda i: (i, 0)),
            ),
            compiler_params=compiler_params,
        )(alpha1d, bias1d, avg, xp)
        out = out.reshape(rows_pad, hidden)[:rows]
        return out.reshape(orig_shape)

    # ---- Row-wise path (hidden >= 128, lane-dense when a multiple of 128) ----
    tile = tile_rows if tile_rows is not None else _pick_tile_rows(
        rows, hidden, itemsize, itemsize, vmem_limit)
    out = pl.pallas_call(
        functools.partial(_ln_rowwise_kernel, eps=float(eps)),
        out_shape=jax.ShapeDtypeStruct((rows, hidden), x.dtype),
        grid_spec=pltpu.PrefetchScalarGridSpec(
            num_scalar_prefetch=0,
            grid=(pl.cdiv(rows, tile),),                 # ragged last block, no padding copy
            in_specs=[
                pl.BlockSpec(memory_space=pltpu.MemorySpace.SMEM),       # alpha (1,)
                pl.BlockSpec(memory_space=pltpu.MemorySpace.SMEM),       # bias  (1,)
                pl.BlockSpec((tile, hidden), lambda i: (i, 0)),
            ],
            out_specs=pl.BlockSpec((tile, hidden), lambda i: (i, 0)),
        ),
        compiler_params=compiler_params,
    )(alpha1d, bias1d, x2d)
    return out.reshape(orig_shape)


if __name__ == "__main__":
    key = jax.random.PRNGKey(0)

    # Params matching nn.Parameter(torch.ones(1)) / nn.Parameter(torch.zeros(1)).
    alpha = jnp.ones((1,), dtype=jnp.float32)
    bias = jnp.zeros((1,), dtype=jnp.float32)
    eps = 1e-6

    def ref_ln(x):
        mean = jnp.mean(x, axis=-1, keepdims=True)
        std = jnp.std(x, axis=-1, keepdims=True, ddof=1)   # torch.std default: unbiased
        return alpha * (x - mean) / (std + eps) + bias

    # Main case from the module's usage: (batch=2, seq=8, hidden=32) -> packed path.
    batch, seq, hidden = 2, 8, 32
    x = jax.random.normal(key, (batch, seq, hidden), dtype=jnp.float32)
    y = jax.block_until_ready(layer_normalization(x, alpha, bias, eps))
    assert jnp.allclose(y, ref_ln(x), atol=1e-5, rtol=1e-5)

    # Also exercise the row-wise (hidden >= 128) path on a tiny shape.
    x2 = jax.random.normal(jax.random.PRNGKey(1), (2, 8, 256), dtype=jnp.float32)
    y2 = jax.block_until_ready(layer_normalization(x2, alpha, bias, eps))
    assert jnp.allclose(y2, ref_ln(x2), atol=1e-5, rtol=1e-5)

    print("KERNEL_OK")
</pallas_src>

<mosaic_0001>
module attributes {stable_mosaic.version = 11 : i64} {
  func.func @_ln_packed_kernel(%arg0: i32, %arg1: memref<1xf32, #tpu.memory_space<smem>>, %arg2: memref<1xf32, #tpu.memory_space<smem>>, %arg3: memref<128x128xf32, #tpu.memory_space<vmem>>, %arg4: memref<4x128xf32, #tpu.memory_space<vmem>>, %arg5: memref<4x128xf32, #tpu.memory_space<vmem>>) attributes {dimension_semantics = [#tpu.dimension_semantics<parallel>], iteration_bounds = array<i64: 1>, scalar_prefetch = 0 : i64, scratch_operands = 0 : i64, tpu.core_type = #tpu.core_type<tc>, window_params = [{transform_indices = @transform_0, window_bounds = array<i64: 1>}, {transform_indices = @transform_1, window_bounds = array<i64: 1>}, {pipeline_mode = #tpu.pipeline_mode<synchronous>, transform_indices = @transform_2, window_bounds = array<i64: 128, 128>}, {transform_indices = @transform_3, window_bounds = array<i64: 4, 128>}, {transform_indices = @transform_4, window_bounds = array<i64: 4, 128>}]} {
    %c0 = arith.constant 0 : index
    %c0_0 = arith.constant 0 : index
    %0 = vector.load %arg3[%c0, %c0_0] : memref<128x128xf32, #tpu.memory_space<vmem>>, vector<128x128xf32>
    %c0_1 = arith.constant 0 : index
    %c0_2 = arith.constant 0 : index
    %1 = vector.load %arg4[%c0_1, %c0_2] : memref<4x128xf32, #tpu.memory_space<vmem>>, vector<4x128xf32>
    %cst = arith.constant dense<0.000000e+00> : vector<4x128xf32>
    %2 = tpu.matmul %1, %0, %cst {dimension_numbers = #tpu.dot_dimension_numbers<[1], [0], [0], [1], [0, 0, 1, 1], [], []>} : vector<4x128xf32>, vector<128x128xf32>, vector<4x128xf32> -> vector<4x128xf32>
    %c0_3 = arith.constant 0 : index
    %c0_4 = arith.constant 0 : index
    %3 = vector.load %arg4[%c0_3, %c0_4] : memref<4x128xf32, #tpu.memory_space<vmem>>, vector<4x128xf32>
    %4 = arith.subf %3, %2 : vector<4x128xf32>
    %5 = arith.mulf %4, %4 : vector<4x128xf32>
    %cst_5 = arith.constant dense<0.000000e+00> : vector<4x128xf32>
    %6 = tpu.matmul %5, %0, %cst_5 {dimension_numbers = #tpu.dot_dimension_numbers<[1], [0], [0], [1], [0, 0, 1, 1], [], []>} : vector<4x128xf32>, vector<128x128xf32>, vector<4x128xf32> -> vector<4x128xf32>
    %cst_6 = arith.constant 3.200000e+01 : f32
    %cst_7 = arith.constant 1.000000e+00 : f32
    %7 = arith.subf %cst_6, %cst_7 : f32
    %cst_8 = arith.constant 3.200000e+01 : f32
    %8 = arith.divf %cst_8, %7 : f32
    %9 = vector.broadcast %8 : f32 to vector<4x128xf32>
    %10 = arith.mulf %6, %9 : vector<4x128xf32>
    %11 = math.sqrt %10 : vector<4x128xf32>
    %cst_9 = arith.constant 9.99999997E-7 : f32
    %12 = vector.broadcast %cst_9 : f32 to vector<4x128xf32>
    %13 = arith.addf %11, %12 : vector<4x128xf32>
    %14 = tpu.reciprocal %13 {approx = true} : vector<4x128xf32> -> vector<4x128xf32>
    %15 = arith.mulf %13, %14 : vector<4x128xf32>
    %cst_10 = arith.constant 2.000000e+00 : f32
    %16 = vector.broadcast %cst_10 : f32 to vector<4x128xf32>
    %17 = arith.subf %16, %15 : vector<4x128xf32>
    %18 = arith.mulf %14, %17 : vector<4x128xf32>
    %c0_11 = arith.constant 0 : index
    %19 = memref.load %arg1[%c0_11] : memref<1xf32, #tpu.memory_space<smem>>
    %20 = vector.broadcast %19 : f32 to vector<4x128xf32>
    %21 = arith.mulf %20, %18 : vector<4x128xf32>
    %22 = arith.mulf %4, %21 : vector<4x128xf32>
    %c0_12 = arith.constant 0 : index
    %23 = memref.load %arg2[%c0_12] : memref<1xf32, #tpu.memory_space<smem>>
    %24 = vector.broadcast %23 : f32 to vector<4x128xf32>
    %25 = arith.addf %22, %24 : vector<4x128xf32>
    %c0_13 = arith.constant 0 : index
    %c0_14 = arith.constant 0 : index
    %26 = vector.load %arg5[%c0_13, %c0_14] : memref<4x128xf32, #tpu.memory_space<vmem>>, vector<4x128xf32>
    tpu.vector_store %arg5[%c0_13, %c0_14], %25 {strides = array<i32>} : memref<4x128xf32, #tpu.memory_space<vmem>>, vector<4x128xf32>,
    return
  }
  func.func @transform_0(%arg0: i32) -> i32 {
    %c0_i32 = arith.constant 0 : i32
    %c0_i32_0 = arith.constant 0 : i32
    return %c0_i32 : i32
  }
  func.func @transform_1(%arg0: i32) -> i32 {
    %c0_i32 = arith.constant 0 : i32
    %c0_i32_0 = arith.constant 0 : i32
    return %c0_i32 : i32
  }
  func.func @transform_2(%arg0: i32) -> (i32, i32) {
    %c0_i32 = arith.constant 0 : i32
    %c0_i32_0 = arith.constant 0 : i32
    %c0_i32_1 = arith.constant 0 : i32
    return %c0_i32, %c0_i32_0 : i32, i32
  }
  func.func @transform_3(%arg0: i32) -> (i32, i32) {
    %c0_i32 = arith.constant 0 : i32
    %c0_i32_0 = arith.constant 0 : i32
    return %arg0, %c0_i32 : i32, i32
  }
  func.func @transform_4(%arg0: i32) -> (i32, i32) {
    %c0_i32 = arith.constant 0 : i32
    %c0_i32_0 = arith.constant 0 : i32
    return %arg0, %c0_i32 : i32, i32
  }
}

</mosaic_0001>

<bundles_post_ra>
// kernel: tpu_custom_call.1
= control target key start
LH: loop header
LB: loop body
LE: loop exit
PB: predicated region body
PF: predicated region fallthrough
CT: control target
= control target key end

     0   :  { %11 = vsyncpa [#allocation5], 0  ;;  %s467_s0 = inlined_call_operand.<no memory space> [shape: f32[1], index: 0, kind: input, shape index: {}]   ;;  %s468_s1 = inlined_call_operand.<no memory space> [shape: f32[1], index: 1, kind: input, shape index: {}]   ;;  %s469_s2 = inlined_call_operand.hbm [shape: f32[128,128], index: 2, kind: input, shape index: {}]   ;;  %s470_s3 = inlined_call_operand.vmem [shape: f32[4,128], index: 3, kind: input, shape index: {}]   ;;  %s471_s4 = inlined_call_operand.hbm [shape: f32[4,128], index: 4, kind: output, shape index: {}]  }
   0x1   :  { %12 = vsyncpa [#allocation6], 0  ;;  %s387_s15 = smov [#allocation4]  }
   0x2   :  { %s22_s16 = sshll.u32 %s387_s15, 4  ;;  %s23_s16 = int_to_ptr.vmem [resolvable:$true] %s22_s16 }
   0x3   :  { %s351_s17 = scalar_lea.vmem %s23_s16, 2048  ;;  %p356_p1 = scmp.lt.s32.totalorder %s23_s16, %s23_s16 }
   0x4   :  { %p352_p0 = scmp.ne.s32.totalorder %s23_s16, %s351_s17  ;;  %p357_p2 = scmp.lt.s32.totalorder %s351_s17, %s351_s17 }
   0x6   :  { %p358_p3 = por %p357_p2, %p356_p1 }
   0x8   :  { %p359_p4 = pnand %p358_p3, %p352_p0 }
   0xa   :  { %362 = shalt.err (!%p359_p4)
}
   0xb   :  { %s388_s18 = smov 128   ;;  %s389_s19 = smov 8  }
   0xc   :  { %28 = dma.hbm_to_vmem [thread:$0]  %s469_s2, 2048, %s23_s16, [#allocation5], %s388_s18, %s388_s18, %s389_s19  }
   0xd   :  { %383 = dma.done.wait [#allocation5], 2048  }
   0xe   :  { %384 = vsyncadd [#allocation5], 4294965248  ;;  %v390_v0 = vmov 0.0   ;;  %vm391_vm0 = vmmov 0   ;;  %v49_v1 = vld [vmem:[#allocation4 + $0x78] sm:$0xff]  ;;  %v48_v2 = vld [vmem:[#allocation4 + $0x70] sm:$0xff]  ;;  %v207_v34 = vstv %s467_s0  ;;  %v211_v37 = vstv %s468_s1 }
   0xf   :  { %263 = vmatprep.subr.mxu0 %v390_v0  ;;  %295 = vmatprep.mubr.msk.f32.mxu0 %vm391_vm0, %v390_v0  ;;  %v47_v3 = vld [vmem:[#allocation4 + $0x68] sm:$0xff]  ;;  %v46_v4 = vld [vmem:[#allocation4 + $0x60] sm:$0xff]  ;;  %v45_v5 = vld [vmem:[#allocation4 + $0x58] sm:$0xff]  ;;  %s392_s26 = smov [#allocation7]  }
  0x10   :  { %298 = vmatprep.subr.mxu1 %v390_v0  ;;  %330 = vmatprep.mubr.msk.f32.mxu1 %vm391_vm0, %v390_v0  ;;  %v44_v6 = vld [vmem:[#allocation4 + $0x50] sm:$0xff]  ;;  %v43_v7 = vld [vmem:[#allocation4 + $0x48] sm:$0xff]  ;;  %v42_v8 = vld [vmem:[#allocation4 + $0x40] sm:$0xff]  ;;  %s220_s27 = sshll.u32 %s392_s26, 4  ;;  %s221_s27 = int_to_ptr.vmem [resolvable:$true] %s220_s27 }
  0x11   :  { %264 = vmatpush3.msra.mxu0 %v49_v1  ;;  %299 = vmatpush3.msra.mxu1 %v49_v1  ;;  %v41_v9 = vld [vmem:[#allocation4 + $0x38] sm:$0xff]  ;;  %v40_v10 = vld [vmem:[#allocation4 + $0x30] sm:$0xff]  ;;  %v39_v11 = vld [vmem:[#allocation4 + $0x28] sm:$0xff]  ;;  %s363_s28 = scalar_lea.vmem %s221_s27, 64  ;;  %p368_p6 = scmp.lt.s32.totalorder %s221_s27, %s221_s27 }
  0x12   :  { %265 = vmatprep.subr.mxu0 %v390_v0  ;;  %300 = vmatprep.subr.mxu1 %v390_v0  ;;  %v38_v12 = vld [vmem:[#allocation4 + $0x20] sm:$0xff]  ;;  %v37_v13 = vld [vmem:[#allocation4 + $0x18] sm:$0xff]  ;;  %v36_v14 = vld [vmem:[#allocation4 + $0x10] sm:$0xff]  ;;  %p364_p5 = scmp.ne.s32.totalorder %s221_s27, %s363_s28  ;;  %p369_p7 = scmp.lt.s32.totalorder %s363_s28, %s363_s28 }
  0x13   :  { %266 = vmatpush3.msra.mxu0 %v48_v2  ;;  %301 = vmatpush3.msra.mxu1 %v48_v2  ;;  %v35_v15 = vld [vmem:[#allocation4 + $0x8] sm:$0xff]  ;;  %v34_v16 = vld [vmem:[#allocation4] sm:$0xff] }
  0x14   :  { %267 = vmatprep.subr.mxu0 %v390_v0  ;;  %302 = vmatprep.subr.mxu1 %v390_v0  ;;  %v50_v17 = vld [vmem:[%s470_s3] sm:$0xf]  ;;  %p370_p8 = por %p369_p7, %p368_p6 }
  0x15   :  { %268 = vmatpush3.msra.mxu0 %v47_v3  ;;  %303 = vmatpush3.msra.mxu1 %v47_v3 }
  0x16   :  { %269 = vmatprep.subr.mxu0 %v390_v0  ;;  %304 = vmatprep.subr.mxu1 %v390_v0  ;;  %p371_p9 = pnand %p370_p8, %p364_p5 }
  0x17   :  { %270 = vmatpush3.msra.mxu0 %v46_v4  ;;  %305 = vmatpush3.msra.mxu1 %v46_v4 }
  0x18   :  { %271 = vmatprep.subr.mxu0 %v390_v0  ;;  %306 = vmatprep.subr.mxu1 %v390_v0 }
  0x19   :  { %272 = vmatpush3.msra.mxu0 %v45_v5  ;;  %307 = vmatpush3.msra.mxu1 %v45_v5 }
  0x1a   :  { %273 = vmatprep.subr.mxu0 %v390_v0  ;;  %308 = vmatprep.subr.mxu1 %v390_v0 }
  0x1b   :  { %274 = vmatpush3.msra.mxu0 %v44_v6  ;;  %309 = vmatpush3.msra.mxu1 %v44_v6 }
  0x1c   :  { %275 = vmatprep.subr.mxu0 %v390_v0  ;;  %310 = vmatprep.subr.mxu1 %v390_v0 }
  0x1d   :  { %276 = vmatpush3.msra.mxu0 %v43_v7  ;;  %311 = vmatpush3.msra.mxu1 %v43_v7 }
  0x1e   :  { %277 = vmatprep.subr.mxu0 %v390_v0  ;;  %312 = vmatprep.subr.mxu1 %v390_v0 }
  0x1f   :  { %278 = vmatpush3.msra.mxu0 %v42_v8  ;;  %313 = vmatpush3.msra.mxu1 %v42_v8 }
  0x20   :  { %279 = vmatprep.subr.mxu0 %v390_v0  ;;  %314 = vmatprep.subr.mxu1 %v390_v0 }
  0x21   :  { %280 = vmatpush3.msra.mxu0 %v41_v9  ;;  %315 = vmatpush3.msra.mxu1 %v41_v9 }
  0x22   :  { %281 = vmatprep.subr.mxu0 %v390_v0  ;;  %316 = vmatprep.subr.mxu1 %v390_v0 }
  0x23   :  { %282 = vmatpush3.msra.mxu0 %v40_v10  ;;  %317 = vmatpush3.msra.mxu1 %v40_v10 }
  0x24   :  { %283 = vmatprep.subr.mxu0 %v390_v0  ;;  %318 = vmatprep.subr.mxu1 %v390_v0 }
  0x25   :  { %284 = vmatpush3.msra.mxu0 %v39_v11  ;;  %319 = vmatpush3.msra.mxu1 %v39_v11 }
  0x26   :  { %285 = vmatprep.subr.mxu0 %v390_v0  ;;  %320 = vmatprep.subr.mxu1 %v390_v0 }
  0x27   :  { %286 = vmatpush3.msra.mxu0 %v38_v12  ;;  %321 = vmatpush3.msra.mxu1 %v38_v12 }
  0x28   :  { %287 = vmatprep.subr.mxu0 %v390_v0  ;;  %322 = vmatprep.subr.mxu1 %v390_v0 }
  0x29   :  { %288 = vmatpush3.msra.mxu0 %v37_v13  ;;  %323 = vmatpush3.msra.mxu1 %v37_v13 }
  0x2a   :  { %289 = vmatprep.subr.mxu0 %v390_v0  ;;  %324 = vmatprep.subr.mxu1 %v390_v0 }
  0x2b   :  { %290 = vmatpush3.msra.mxu0 %v36_v14  ;;  %325 = vmatpush3.msra.mxu1 %v36_v14 }
  0x2c   :  { %291 = vmatprep.subr.mxu0 %v390_v0  ;;  %326 = vmatprep.subr.mxu1 %v390_v0 }
  0x2d   :  { %292 = vmatpush3.msra.mxu0 %v35_v15  ;;  %327 = vmatpush3.msra.mxu1 %v35_v15 }
  0x2e   :  { %293 = vmatprep.subr.mxu0 %v390_v0  ;;  %328 = vmatprep.subr.mxu1 %v390_v0 }
  0x2f   :  { %294 = vmatpush3.msra.mxu0 %v34_v16  ;;  %329 = vmatpush3.msra.mxu1 %v34_v16 }
  0x30   :  { %296 = vmatmul.mubr.f32.vlgmr.msra.gmra.mxu0 %v50_v17 }
  0xf0   :  { %v117_v18 = vpop.f32.mrf.mxu0 }
  0xf1   :  { %v121_v19 = vsub.f32 %v50_v17, %v117_v18 }
  0xf2   :  { %v297_v20 = vpop.f32.mrf.mxu0 }
  0xf3   :  { %v122_v21 = vmul.f32 %v121_v19, %v121_v19 }
  0xf5   :  { %331 = vmatmul.mubr.f32.vlgmr.msra.gmra.mxu1 %v122_v21 }
 0x1b5   :  { %v189_v22 = vpop.f32.mrf.mxu1 }
 0x1b6   :  { %v193_v23 = vmul.f32 1.032258, %v189_v22 }
 0x1b7   :  { %v332_v24 = vpop.f32.mrf.mxu1 }
 0x1b8   :  { %339 = vrsqrt.f32 %v193_v23  ;;  %vm196_vm1 = vcmp.eq.f32.partialorder %v193_v23, inf  ;;  %v199_v27 = vand.u32 2147483648, %v193_v23  ;;  %vm198_vm2 = vcmp.eq.f32.partialorder %v193_v23, 0.0 }
 0x1c5   :  { %v340_v25 = vpop.eup %339 }
 0x1c6   :  { %v195_v26 = vmul.f32 %v340_v25, %v193_v23 }
 0x1c8   :  { %v197_v28 = vsel %vm196_vm1, %v193_v23, %v195_v26 }
 0x1c9   :  { %v200_v29 = vsel %vm198_vm2, %v199_v27, %v197_v28 }
 0x1ca   :  { %v201_v30 = vadd.f32 1e-06, %v200_v29 }
 0x1cc   :  { %341 = vrcp.f32 %v201_v30 }
 0x1d9   :  { %v342_v31 = vpop.eup %341 }
 0x1da   :  { %v203_v32 = vmul.f32 %v342_v31, %v201_v30 }
 0x1dc   :  { %v204_v33 = vsub.f32 2.0, %v203_v32 }
 0x1de   :  { %v205_v35 = vmul.f32 %v342_v31, %v204_v33 }
 0x1e0   :  { %v208_v36 = vmul.f32 %v207_v34, %v205_v35 }
 0x1e2   :  { %v209_v38 = vmul.f32 %v208_v36, %v121_v19 }
 0x1e4   :  { %v212_v39 = vadd.f32 %v211_v37, %v209_v38 }
 0x1e6   :  { %213 = vst [vmem:[#allocation7] sm:$0xf] %v212_v39 }
 0x1e7   :  { %374 = shalt.err (!%p371_p9)
}
 0x1e8   :  { %223 = dma.vmem_to_hbm [thread:$0]  %s221_s27, 64, %s471_s4, [#allocation6]  }
 0x1e9   :  { %385 = dma.done.wait [#allocation6], 64  }
 0x1ea   :  { %386 = vsyncadd [#allocation6], 4294967232 }
 0x1eb   :  { %227 = vsyncpa [#allocation5], 1 }
 0x1ec   :  { %228 = vsyncpa [#allocation6], 1 }

</bundles_post_ra>
